<compile_context>
chip_gen: v5e
topology: v5e:2x2
jax: 0.10.0
libtpu: 0.0.40
codegen_flags: <defaults>
</compile_context>

<pallas_src>
from functools import partial

import jax
import jax.numpy as jnp
import numpy as np
from jax import lax
from jax.experimental import pallas as pl
from jax.experimental.pallas import tpu as pltpu


def _rpe_kernel(coord_ref, table_ref, out_ref, *, pos_bnd, rpe_num):
    # coord_ref: (1, 3, TN) int32   table_ref: (3, H, rpe_num) f32
    # out_ref  : (1, H, TN) f32
    coord = coord_ref[0]           # (3, TN)   lane-dense coordinate rows
    table = table_ref[...]         # (3, H, rpe_num)
    tn = out_ref.shape[2]
    h = out_ref.shape[1]

    # Sublane iota 0..rpe_num-1, broadcast across the lane-dense point tile.
    row = lax.broadcasted_iota(jnp.int32, (rpe_num, tn), 0)

    acc = jnp.zeros((h, tn), jnp.float32)
    for c in range(3):
        # (1, TN) clipped+shifted index for this coordinate axis.
        idx_c = jnp.clip(coord[c : c + 1, :], -pos_bnd, pos_bnd) + pos_bnd
        # Narrow (rpe_num, TN) one-hot; broadcast of idx_c down sublanes is cheap.
        onehot = (row == idx_c).astype(jnp.float32)
        # Gather-as-matmul on the MXU: (H, rpe_num) @ (rpe_num, TN) -> (H, TN).
        acc = acc + jnp.dot(table[c], onehot, preferred_element_type=jnp.float32)

    out_ref[0] = acc


def _pick_lane_tile(kk, tile_n):
    """Largest lane tile (multiple of 128, <= tile_n) that divides the padded K*K."""
    kk128 = pl.cdiv(kk, 128) * 128
    for cand in (2048, 1024, 768, 512, 384, 256, 128):
        if cand <= tile_n and cand <= kk128 and kk128 % cand == 0:
            return cand
    return 128  # 128 always divides kk128


def rpe_forward(coord, rpe_table, pos_bnd, rpe_num, *, tile_n=512):
    """coord: (B, K, K, 3) int; rpe_table: (3*rpe_num, H) f32 -> (B, H, K, K) f32.

    Note: for tiny problems (a single grid step) the pure-XLA gather path
    (`rpe_reference`) is competitive; this kernel is aimed at production
    N = B * patch_size**2 workloads.
    """
    B, K1, K2, three = coord.shape
    assert three == 3
    r3, H = rpe_table.shape
    assert r3 == 3 * rpe_num

    KK = K1 * K2
    # Points lane-dense: (B, 3, K*K).
    coord_t = jnp.transpose(coord.reshape(B, KK, 3), (0, 2, 1)).astype(jnp.int32)
    # Table grouped per axis with heads on sublanes: (3, H, rpe_num).
    table3 = jnp.transpose(rpe_table.reshape(3, rpe_num, H), (0, 2, 1))

    tile = _pick_lane_tile(KK, tile_n)
    n_tiles = pl.cdiv(KK, tile)
    kk_pad = n_tiles * tile
    if kk_pad != KK:
        coord_t = jnp.pad(coord_t, ((0, 0), (0, 0), (0, kk_pad - KK)))

    out = pl.pallas_call(
        partial(_rpe_kernel, pos_bnd=pos_bnd, rpe_num=rpe_num),
        out_shape=jax.ShapeDtypeStruct((B, H, kk_pad), jnp.float32),
        grid=(B, n_tiles),
        in_specs=[
            pl.BlockSpec((1, 3, tile), lambda b, t: (b, 0, t)),        # coord tile
            pl.BlockSpec((3, H, rpe_num), lambda b, t: (0, 0, 0)),     # full table, resident
        ],
        out_specs=pl.BlockSpec((1, H, tile), lambda b, t: (b, 0, t)),
        compiler_params=pltpu.CompilerParams(
            dimension_semantics=("parallel", "parallel")
        ),
    )(coord_t, table3)

    if kk_pad != KK:
        out = out[:, :, :KK]
    return out.reshape(B, H, K1, K2)


def rpe_reference(coord, rpe_table, pos_bnd, rpe_num):
    """Pure-JAX reference mirroring the PyTorch forward."""
    idx = (
        jnp.clip(coord, -pos_bnd, pos_bnd)
        + pos_bnd
        + jnp.arange(3, dtype=coord.dtype) * rpe_num
    )
    out = jnp.take(rpe_table, idx.reshape(-1), axis=0)
    out = out.reshape(idx.shape + (rpe_table.shape[1],)).sum(axis=3)
    return jnp.transpose(out, (0, 3, 1, 2))


if __name__ == "__main__":
    # Module hyperparameters (mirror RPE.__init__).
    patch_size = 48
    num_heads = 8
    pos_bnd = int((4 * patch_size) ** (1 / 3) * 2)   # = 11
    rpe_num = 2 * pos_bnd + 1                        # = 23

    key = jax.random.PRNGKey(0)
    k_table, k_coord = jax.random.split(key)

    # Deterministic trunc-normal init (std=0.02, truncated at +-2 std).
    rpe_table = 0.02 * jax.random.truncated_normal(
        k_table, -2.0, 2.0, (3 * rpe_num, num_heads), dtype=jnp.float32
    )

    # Small example: B=2 patches, K=8 points per side -> coord (2, 8, 8, 3).
    B, K = 2, 8
    coord = jax.random.randint(
        k_coord, (B, K, K, 3), minval=-15, maxval=16, dtype=jnp.int32
    )

    out = rpe_forward(coord, rpe_table, pos_bnd, rpe_num)
    out = jax.block_until_ready(out)

    ref = rpe_reference(coord, rpe_table, pos_bnd, rpe_num)
    np.testing.assert_allclose(np.asarray(out), np.asarray(ref), rtol=1e-5, atol=1e-6)
    assert out.shape == (B, num_heads, K, K)

    print("KERNEL_OK")
</pallas_src>

<mosaic_0001>
module attributes {stable_mosaic.version = 11 : i64} {
  func.func @_rpe_kernel(%arg0: i32, %arg1: i32, %arg2: memref<1x3x128xi32, #tpu.memory_space<vmem>>, %arg3: memref<3x8x23xf32, #tpu.memory_space<vmem>>, %arg4: memref<1x8x128xf32, #tpu.memory_space<vmem>>) attributes {dimension_semantics = [#tpu.dimension_semantics<parallel>, #tpu.dimension_semantics<parallel>], iteration_bounds = array<i64: 2, 1>, scalar_prefetch = 0 : i64, scratch_operands = 0 : i64, tpu.core_type = #tpu.core_type<tc>, window_params = [{transform_indices = @transform_0, window_bounds = array<i64: 1, 3, 128>}, {pipeline_mode = #tpu.pipeline_mode<synchronous>, transform_indices = @transform_1, window_bounds = array<i64: 3, 8, 23>}, {transform_indices = @transform_2, window_bounds = array<i64: 1, 8, 128>}]} {
    %c0 = arith.constant 0 : index
    %c0_0 = arith.constant 0 : index
    %c0_1 = arith.constant 0 : index
    %0 = vector.load %arg2[%c0, %c0_0, %c0_1] : memref<1x3x128xi32, #tpu.memory_space<vmem>>, vector<1x3x128xi32>
    %1 = vector.shape_cast %0 : vector<1x3x128xi32> to vector<3x128xi32>
    %c0_2 = arith.constant 0 : index
    %c0_3 = arith.constant 0 : index
    %c0_4 = arith.constant 0 : index
    %2 = vector.load %arg3[%c0_2, %c0_3, %c0_4] : memref<3x8x23xf32, #tpu.memory_space<vmem>>, vector<3x8x23xf32>
    %3 = tpu.iota {dimensions = array<i32: 0>} : vector<23x128xi32>
    %cst = arith.constant 0.000000e+00 : f32
    %4 = vector.broadcast %cst : f32 to vector<8x128xf32>
    %5 = vector.extract_strided_slice %1 {offsets = [0, 0], sizes = [1, 128], strides = [1, 1]} : vector<3x128xi32> to vector<1x128xi32>
    %c-11_i32 = arith.constant -11 : i32
    %c11_i32 = arith.constant 11 : i32
    %6 = vector.broadcast %c-11_i32 : i32 to vector<1x128xi32>
    %7 = arith.maxsi %6, %5 : vector<1x128xi32>
    %8 = vector.broadcast %c11_i32 : i32 to vector<1x128xi32>
    %9 = arith.minsi %8, %7 : vector<1x128xi32>
    %c11_i32_5 = arith.constant 11 : i32
    %10 = vector.broadcast %c11_i32_5 : i32 to vector<1x128xi32>
    %11 = arith.addi %9, %10 : vector<1x128xi32>
    %12 = vector.broadcast %11 : vector<1x128xi32> to vector<23x128xi32>
    %13 = arith.cmpi eq, %3, %12 : vector<23x128xi32>
    %14 = arith.extui %13 : vector<23x128xi1> to vector<23x128xi32>
    %15 = arith.sitofp %14 : vector<23x128xi32> to vector<23x128xf32>
    %16 = vector.extract_strided_slice %2 {offsets = [0, 0, 0], sizes = [1, 8, 23], strides = [1, 1, 1]} : vector<3x8x23xf32> to vector<1x8x23xf32>
    %17 = vector.shape_cast %16 : vector<1x8x23xf32> to vector<8x23xf32>
    %cst_6 = arith.constant dense<0.000000e+00> : vector<8x128xf32>
    %18 = tpu.matmul %17, %15, %cst_6 {dimension_numbers = #tpu.dot_dimension_numbers<[1], [0], [0], [1], [0, 0, 1, 1], [], []>} : vector<8x23xf32>, vector<23x128xf32>, vector<8x128xf32> -> vector<8x128xf32>
    %19 = arith.addf %4, %18 : vector<8x128xf32>
    %20 = vector.extract_strided_slice %1 {offsets = [1, 0], sizes = [1, 128], strides = [1, 1]} : vector<3x128xi32> to vector<1x128xi32>
    %c-11_i32_7 = arith.constant -11 : i32
    %c11_i32_8 = arith.constant 11 : i32
    %21 = vector.broadcast %c-11_i32_7 : i32 to vector<1x128xi32>
    %22 = arith.maxsi %21, %20 : vector<1x128xi32>
    %23 = vector.broadcast %c11_i32_8 : i32 to vector<1x128xi32>
    %24 = arith.minsi %23, %22 : vector<1x128xi32>
    %c11_i32_9 = arith.constant 11 : i32
    %25 = vector.broadcast %c11_i32_9 : i32 to vector<1x128xi32>
    %26 = arith.addi %24, %25 : vector<1x128xi32>
    %27 = vector.broadcast %26 : vector<1x128xi32> to vector<23x128xi32>
    %28 = arith.cmpi eq, %3, %27 : vector<23x128xi32>
    %29 = arith.extui %28 : vector<23x128xi1> to vector<23x128xi32>
    %30 = arith.sitofp %29 : vector<23x128xi32> to vector<23x128xf32>
    %31 = vector.extract_strided_slice %2 {offsets = [1, 0, 0], sizes = [1, 8, 23], strides = [1, 1, 1]} : vector<3x8x23xf32> to vector<1x8x23xf32>
    %32 = vector.shape_cast %31 : vector<1x8x23xf32> to vector<8x23xf32>
    %cst_10 = arith.constant dense<0.000000e+00> : vector<8x128xf32>
    %33 = tpu.matmul %32, %30, %cst_10 {dimension_numbers = #tpu.dot_dimension_numbers<[1], [0], [0], [1], [0, 0, 1, 1], [], []>} : vector<8x23xf32>, vector<23x128xf32>, vector<8x128xf32> -> vector<8x128xf32>
    %34 = arith.addf %19, %33 : vector<8x128xf32>
    %35 = vector.extract_strided_slice %1 {offsets = [2, 0], sizes = [1, 128], strides = [1, 1]} : vector<3x128xi32> to vector<1x128xi32>
    %c-11_i32_11 = arith.constant -11 : i32
    %c11_i32_12 = arith.constant 11 : i32
    %36 = vector.broadcast %c-11_i32_11 : i32 to vector<1x128xi32>
    %37 = arith.maxsi %36, %35 : vector<1x128xi32>
    %38 = vector.broadcast %c11_i32_12 : i32 to vector<1x128xi32>
    %39 = arith.minsi %38, %37 : vector<1x128xi32>
    %c11_i32_13 = arith.constant 11 : i32
    %40 = vector.broadcast %c11_i32_13 : i32 to vector<1x128xi32>
    %41 = arith.addi %39, %40 : vector<1x128xi32>
    %42 = vector.broadcast %41 : vector<1x128xi32> to vector<23x128xi32>
    %43 = arith.cmpi eq, %3, %42 : vector<23x128xi32>
    %44 = arith.extui %43 : vector<23x128xi1> to vector<23x128xi32>
    %45 = arith.sitofp %44 : vector<23x128xi32> to vector<23x128xf32>
    %46 = vector.extract_strided_slice %2 {offsets = [2, 0, 0], sizes = [1, 8, 23], strides = [1, 1, 1]} : vector<3x8x23xf32> to vector<1x8x23xf32>
    %47 = vector.shape_cast %46 : vector<1x8x23xf32> to vector<8x23xf32>
    %cst_14 = arith.constant dense<0.000000e+00> : vector<8x128xf32>
    %48 = tpu.matmul %47, %45, %cst_14 {dimension_numbers = #tpu.dot_dimension_numbers<[1], [0], [0], [1], [0, 0, 1, 1], [], []>} : vector<8x23xf32>, vector<23x128xf32>, vector<8x128xf32> -> vector<8x128xf32>
    %49 = arith.addf %34, %48 : vector<8x128xf32>
    %c0_15 = arith.constant 0 : index
    %c0_16 = arith.constant 0 : index
    %c0_17 = arith.constant 0 : index
    %50 = vector.load %arg4[%c0_15, %c0_16, %c0_17] : memref<1x8x128xf32, #tpu.memory_space<vmem>>, vector<1x8x128xf32>
    %51 = vector.shape_cast %50 : vector<1x8x128xf32> to vector<8x128xf32>
    %52 = vector.shape_cast %49 : vector<8x128xf32> to vector<1x8x128xf32>
    tpu.vector_store %arg4[%c0_15, %c0_16, %c0_17], %52 {strides = array<i32>} : memref<1x8x128xf32, #tpu.memory_space<vmem>>, vector<1x8x128xf32>,
    return
  }
  func.func @transform_0(%arg0: i32, %arg1: i32) -> (i32, i32, i32) {
    %c0_i32 = arith.constant 0 : i32
    %c0_i32_0 = arith.constant 0 : i32
    return %arg0, %c0_i32, %arg1 : i32, i32, i32
  }
  func.func @transform_1(%arg0: i32, %arg1: i32) -> (i32, i32, i32) {
    %c0_i32 = arith.constant 0 : i32
    %c0_i32_0 = arith.constant 0 : i32
    %c0_i32_1 = arith.constant 0 : i32
    %c0_i32_2 = arith.constant 0 : i32
    return %c0_i32, %c0_i32_0, %c0_i32_1 : i32, i32, i32
  }
  func.func @transform_2(%arg0: i32, %arg1: i32) -> (i32, i32, i32) {
    %c0_i32 = arith.constant 0 : i32
    %c0_i32_0 = arith.constant 0 : i32
    return %arg0, %c0_i32, %arg1 : i32, i32, i32
  }
}

</mosaic_0001>

<bundles_post_ra>
// kernel: tpu_custom_call.1
= control target key start
LH: loop header
LB: loop body
LE: loop exit
PB: predicated region body
PF: predicated region fallthrough
CT: control target
= control target key end

     0   :  { %7 = vsyncpa [#allocation3], 0  ;;  %s744_s0 = inlined_call_operand.vmem [shape: s32[2,3,128], index: 0, kind: input, shape index: {}]   ;;  %s745_s1 = inlined_call_operand.hbm [shape: f32[3,8,23], index: 1, kind: input, shape index: {}]   ;;  %s746_s2 = inlined_call_operand.hbm [shape: f32[2,8,128], index: 2, kind: output, shape index: {}]  }
   0x1   :  { %8 = vsyncpa [#allocation4], 0 }
   0x2   :  { %10 = vsyncpa [#allocation4 + $0x1], 0  ;;  %s644_s9 = smov 0   ;;  %s646_s10 = smov 0  }
   0x3   :  { %s648_s11 = smov 0   ;;  %s650_s12 = smov 0  }
   0x4   :  { %s652_s13 = smov 0   ;;  %s654_s14 = smov 0  }
   0x5 LB: > { %s406_s15 = sadd.s32 4294967295, %s622_s14   ;;  %s407_s16 = sadd.s32 4294967294, %s622_s14   ;;  %s622_s14 = sphi %s654_s14, %s16_s14   ;;  %s618_s13 = sphi %s652_s13, %s753_s13   ;;  %s614_s12 = sphi %s650_s12, %s752_s12   ;;  %s610_s11 = sphi %s648_s11, %s751_s11   ;;  %s606_s10 = sphi %s646_s10, %s750_s10   ;;  %s602_s9 = sphi %s644_s9, %s749_s9  }
   0x6   : > { %s28_s17 = sadd.s32 1, %s618_s13  ;;  %s86_s18 = sadd.s32 1, %s610_s11 }
   0x7   : > { %p30_p0 = scmp.ge.s32.totalorder %s28_s17, 2  ;;  %p96_p1 = scmp.ne.s32.totalorder %s610_s11, %s606_s10 }
   0x8   : > { %p97_p2 = scmp.eq.s32.totalorder %s406_s15, 1  ;;  %p102_p3 = scmp.ne.s32.totalorder %s606_s10, %s602_s9 }
   0x9   : > { %s755_s17 = smov (%p30_p0, %s28_s17), 0  ;;  %p103_p5 = scmp.eq.s32.totalorder %s407_s16, 1 }
   0xa   : > { %p684_p4 = por %p97_p2, %p96_p1  ;;  %s81_s20 = ssub.s32 %s618_s13, %s755_s17 }
   0xb   : > { %p408_p6 = scmp.ge.s32.totalorder %s622_s14, 1  ;;  %p84_p7 = scmp.eq.s32.totalorder %s81_s20, 0 }
   0xc   : > { %p691_p8 = por %p103_p5, %p102_p3  ;;  %p110_p9 = scmp.lt.s32.totalorder %s622_s14, 3 }
   0xd   : > { %s697_s22 = scalar_select %p84_p7, %s610_s11, %s86_s18  }
   0xe   : > { %p111_p10 = pnand %p408_p6, %p110_p9  ;;  %p454_p11 = scmp.eq.s32.totalorder %s406_s15, 0 }
   0xf   : > { %s121_s25 = sshll.u32 %s745_s1, 4  ;;  %s624_s26 = smov [#allocation2]   ;;  %s122_s25 = int_to_ptr.hbm [resolvable:$true] %s121_s25 }
  0x10   : > { %p446_p12 = pneg %p111_p10  ;;  %s123_s27 = sshll.u32 %s624_s26, 4  ;;  %s124_s27 = int_to_ptr.vmem [resolvable:$true] %s123_s27 }
  0x11   : > { %s625_s28 = smov 128   ;;  %s626_s29 = smov 8  }
  0x12   : > { %p447_p13 = pnand %p454_p11, %p446_p12  ;;  %149 = sbr.rel (%p111_p10) target bundleno = 183 (0xb7), region = 28 }
  0x14   : > { %449 = dma.hbm_to_vmem [thread:$0]  (!%p447_p13), %s122_s25, 384, %s124_s27, [#allocation3], %s625_s28, %s625_s28, %s626_s29  }
  0x17   : > { %593 = dma.done.wait (%p454_p11), [#allocation3], 384  }
  0x18   : > { %595 = vsyncadd (%p454_p11), [#allocation3], 4294966912  ;;  %p174_p0 = scmp.lt.s32.totalorder %s614_s12, 1  ;;  %v185_v0 = vlaneseq  ;;  %vm218_vm2 = vcmask 1046528   ;;  %v627_v11 = vmov 0.0   ;;  %v628_v15 = vmov 1.0  }
  0x19   : > { %v184_v16 = vld [vmem:[#allocation2 + $0x10] sm:$0xff]  ;;  %vm214_vm11 = vcmask 187392   ;;  %v183_v17 = vld [vmem:[#allocation2 + $0x8] sm:$0xff]  ;;  %v182_v18 = vld [vmem:[#allocation2] sm:$0xff]  ;;  %s171_s7 = sand.u32 1, %s606_s10   ;;  %s437_s15 = sshll.u32 %s614_s12, 3 }
  0x1a   : > { %s175_s30 = scalar_select %p174_p0, %s614_s12, 1  ;;  %v186_v2 = vshrl.u32 %v185_v0, 7 }
  0x1b   : > { %s413_s8 = sshll.u32 %s171_s7, 3  ;;  %s318_s20 = scalar_lea.hbm %s746_s2, %s437_s15 }
  0x1c   : > { %s414_s3 = sshll.u32 %s175_s30, 2  ;;  %v188_v5 = vadd.s32 16, %v186_v2  ;;  %v187_v7 = vadd.s32 8, %v186_v2  ;;  %s173_s23 = scalar_lea.vmem [#allocation5], %s413_s8 }
  0x1d   : > { %s180_s6 = scalar_lea.vmem %s744_s0, %s414_s3  ;;  %s320_s24 = sshll.u32 %s173_s23, 4  ;;  %s321_s24 = int_to_ptr.vmem [resolvable:$true] %s320_s24 }
  0x1e   : > { %v181_v1 = vld [vmem:[%s180_s6] sm:$0x7]  ;;  %s322_s25 = sshll.u32 %s318_s20, 4  ;;  %s307_s26 = scalar_lea.sflag [#allocation4], %s171_s7  ;;  %s323_s25 = int_to_ptr.hbm [resolvable:$true] %s322_s25 }
  0x1f   : > { %vm189_vm0 = vcmp.gt.s32.totalorder %v181_v1, 4294967285  ;;  %s554_s27 = sshra.s32 %s323_s25, 4  ;;  %s560_s30 = scalar_lea.hbm %s746_s2, 16  ;;  %s555_s27 = int_to_ptr.hbm [resolvable:$true] %s554_s27 }
  0x20   : > { %v190_v3 = vsel %vm189_vm0, %v181_v1, 4294967285  ;;  %s556_s12 = scalar_lea.hbm %s555_s27, 8  ;;  %p561_p5 = scmp.lt.s32.totalorder %s555_s27, %s746_s2 }
  0x21   : > { %vm191_vm1 = vcmp.lt.s32.totalorder %v190_v3, 11  ;;  %p557_p1 = scmp.ne.s32.totalorder %s555_s27, %s556_s12  ;;  %p562_p6 = scmp.lt.s32.totalorder %s560_s30, %s556_s12 }
  0x22   : > { %v192_v4 = vsel %vm191_vm1, %v190_v3, 11 }
  0x23   : > { %v193_v6 = vadd.s32 11, %v192_v4  ;;  %p558_p2 = pnand %p557_p1, %p684_p4  ;;  %p563_p7 = por %p562_p6, %p561_p5 }
  0x25   : > { %v268_v8 = vperm.slane %v193_v6, 2  ;;  %v204_v9 = vperm.slane %v193_v6, 1  ;;  %v194_v10 = vperm.slane %v193_v6, 0  ;;  %p559_p3 = pneg %p558_p2 }
  0x27   : > { %vm271_vm3 = vcmp.eq.s32.totalorder %v188_v5, %v268_v8  ;;  %vm207_vm4 = vcmp.eq.s32.totalorder %v188_v5, %v204_v9  ;;  %vm197_vm5 = vcmp.eq.s32.totalorder %v188_v5, %v194_v10  ;;  %vm270_vm6 = vcmp.eq.s32.totalorder %v187_v7, %v268_v8  ;;  %p564_p9 = pnand %p563_p7, %p559_p3 }
  0x28   : > { %v431_v12 = vsel %vm271_vm3, 1.0, %v627_v11  ;;  %v420_v13 = vsel %vm207_vm4, 1.0, %v627_v11  ;;  %v417_v14 = vsel %vm197_vm5, 1.0, %v627_v11  ;;  %vm206_vm7 = vcmp.eq.s32.totalorder %v187_v7, %v204_v9 }
  0x29   : > { %432 = vmatpush.msk.msra.mxu2 %vm218_vm2, %v431_v12  ;;  %421 = vmatpush.msk.msra.mxu0 %vm218_vm2, %v420_v13  ;;  %vm196_vm8 = vcmp.eq.s32.totalorder %v187_v7, %v194_v10  ;;  %vm269_vm9 = vcmp.eq.s32.totalorder %v186_v2, %v268_v8  ;;  %vm205_vm10 = vcmp.eq.s32.totalorder %v186_v2, %v204_v9 }
  0x2a   : > { %425 = vmatpush.msk.msra.mxu1 %vm218_vm2, %v417_v14  ;;  %vm195_vm12 = vcmp.eq.s32.totalorder %v186_v2, %v194_v10 }
  0x2b   : > { %433 = vmatpush.msk.msra.mxu2 %vm270_vm6, %v628_v15  ;;  %422 = vmatpush.msk.msra.mxu0 %vm206_vm7, %v628_v15 }
  0x2c   : > { %426 = vmatpush.msk.msra.mxu1 %vm196_vm8, %v628_v15 }
  0x2d   : > { %434 = vmatpush.msk.msra.mxu2 %vm269_vm9, %v628_v15  ;;  %423 = vmatpush.msk.msra.mxu0 %vm205_vm10, %v628_v15 }
  0x2e   : > { %435 = vmatmul.msk.f32.vlgmr.msra.gmra.mxu2 %vm214_vm11, %v184_v16  ;;  %427 = vmatpush.msk.msra.mxu1 %vm195_vm12, %v628_v15 }
  0x2f   : > { %424 = vmatmul.msk.f32.vlgmr.msra.gmra.mxu0 %vm214_vm11, %v183_v17  ;;  %428 = vmatmul.msk.f32.vlgmr.msra.gmra.mxu1 %vm214_vm11, %v182_v18 }
  0xac   : > { %v239_v19 = vpop.f32.mrf.mxu0  ;;  %v265_v20 = vpop.f32.mrf.mxu1 }
  0xad   : > { %v266_v21 = vadd.f32 %v265_v20, %v239_v19 }
  0xb1   : > { %v301_v22 = vpop.f32.mrf.mxu2 }
  0xb2   : > { %v304_v23 = vadd.f32 %v301_v22, %v266_v21 }
  0xb4   : > { %305 = vst [vmem:[%s173_s23] sm:$0xff] %v304_v23 }
  0xb5   : > { %567 = shalt.err (!%p564_p9)
}
  0xb6   : > { %444 = dma.vmem_to_hbm [thread:$0]  (%p684_p4), %s321_s24, 128, %s323_s25, %s307_s26  }
  0xb7 PF: > { %p456_p10 = scmp.ge.s32.totalorder %s622_s14, 2  ;;  %s334_s5 = sand.u32 1, %s602_s9  }
  0xb8   : > { %s335_s6 = scalar_lea.sflag [#allocation4], %s334_s5 }
  0xb9   : > { %p451_p11 = pnand %p456_p10, %p691_p8 }
  0xbb   : > { %p452_p12 = pneg %p451_p11 }
  0xbd   : > { %597 = dma.done.wait (%p452_p12), %s335_s6, 128  }
  0xbe   : > { %599 = vsyncadd (%p452_p12), %s335_s6, 4294967168  ;;  %s16_s14 = sadd.s32 1, %s622_s14   ;;  %s749_s9 = smov %s606_s10 }
  0xbf   : > { %p13_p13 = scmp.ge.s32.totalorder %s16_s14, 4   ;;  %s750_s10 = smov %s610_s11 }
  0xc0   : > { %s751_s11 = smov %s697_s22  ;;  %s752_s12 = smov %s618_s13 }
  0xc1   : > { %s753_s13 = smov %s755_s17  ;;  %15 = sbr.rel (!%p13_p13) target bundleno = 5 (0x5), region = 68 }
  0xc6   :  { %341 = vsyncpa [#allocation3], 1 }
  0xc7   :  { %343 = vsyncpa [#allocation3 + $0x1], 1 }
  0xc8   :  { %344 = vsyncpa [#allocation4], 1 }
  0xc9   :  { %346 = vsyncpa [#allocation4 + $0x1], 1 }

</bundles_post_ra>
